<compile_context>
chip_gen: v5e
topology: v5e:2x2
jax: 0.10.0
libtpu: 0.0.40
codegen_flags: <defaults>
</compile_context>

<pallas_src>
import jax
import jax.numpy as jnp
from jax.experimental import pallas as pl
from jax.experimental.pallas import tpu as pltpu


def logreg_kernel(x_ref, w_ref, b_ref, o_ref):
    # x_ref: (TM, F) tile, w_ref: (1, F) resident weights, b_ref: (1,) scalar in SMEM,
    # o_ref: (1, TM) lane-dense output tile.
    x = x_ref[...]                      # (TM, F), native dtype
    w = w_ref[...]                      # (1, F), same dtype as x
    # Single-row matmul against x^T (the q @ k^T pattern) -> lane-dense (1, TM) in f32.
    z = jnp.dot(w, x.T, preferred_element_type=jnp.float32)
    z = z + b_ref[0]                    # scalar bias from SMEM
    o_ref[...] = (1.0 / (1.0 + jnp.exp(-z))).astype(o_ref.dtype)


def _round_up(x, m):
    return (x + m - 1) // m * m


def logistic_regression(x, weight, bias, *, block_m=1024):
    """x: (N, F); weight: (1, F) [PyTorch nn.Linear layout]; bias: (1,). Returns (N, 1)."""
    n, f = x.shape
    assert weight.shape == (1, f)

    # Row-tile size. Lane-dense output blocks need TM % 128 == 0 when there is
    # more than one tile; a single tile may be any multiple of 8 (it equals the
    # full padded dim).
    if n <= block_m:
        tm = _round_up(max(n, 1), 8)
    else:
        tm = _round_up(block_m, 128)
    n_pad = _round_up(n, tm)
    num_tiles = n_pad // tm

    x_p = jnp.pad(x, ((0, n_pad - n), (0, 0))) if n_pad != n else x
    w = weight.astype(x.dtype)                   # (1, F) lane-dense, resident across grid
    b = bias.astype(jnp.float32).reshape((1,))   # scalar, lives in SMEM

    out = pl.pallas_call(
        logreg_kernel,
        out_shape=jax.ShapeDtypeStruct((1, n_pad), x.dtype),
        grid_spec=pltpu.PrefetchScalarGridSpec(
            num_scalar_prefetch=0,
            grid=(num_tiles,),
            in_specs=[
                pl.BlockSpec((tm, f), lambda i: (i, 0)),            # x row-tile
                pl.BlockSpec((1, f), lambda i: (0, 0)),             # weight (fetched once)
                pl.BlockSpec(memory_space=pltpu.MemorySpace.SMEM),  # bias scalar
            ],
            out_specs=pl.BlockSpec((1, tm), lambda i: (0, i)),      # lane-dense output tile
        ),
        compiler_params=pltpu.CompilerParams(
            dimension_semantics=("parallel",),        # megacore sharding on v7x
            vmem_limit_bytes=32 * 1024 * 1024,        # fits 16/32 MiB scoped defaults
        ),
    )(x_p, w, b)

    return out[0, :n].reshape(n, 1).astype(x.dtype)


if __name__ == "__main__":
    key = jax.random.PRNGKey(0)
    kx, kw, kb = jax.random.split(key, 3)

    # Small shapes, but enough rows to exercise multi-tile pipelining + padding
    # (block_m=128 -> 3 row-tiles over a padded batch of 384).
    batch, n_features = 300, 32
    x = jax.random.normal(kx, (batch, n_features), dtype=jnp.float32)
    # Parameter shapes from nn.Linear(n_features, 1).
    weight = jax.random.normal(kw, (1, n_features), dtype=jnp.float32) * 0.1
    bias = jax.random.normal(kb, (1,), dtype=jnp.float32) * 0.1

    y = logistic_regression(x, weight, bias, block_m=128)
    jax.block_until_ready(y)

    # Sanity check vs. plain JAX reference.
    y_ref = jax.nn.sigmoid(x @ weight.T + bias)
    assert y.shape == (batch, 1)
    assert jnp.allclose(y, y_ref, atol=1e-4), "mismatch vs reference"
    print("KERNEL_OK")
</pallas_src>

<mosaic_0001>
module attributes {stable_mosaic.version = 11 : i64} {
  func.func @logreg_kernel(%arg0: i32, %arg1: memref<128x32xf32, #tpu.memory_space<vmem>>, %arg2: memref<1x32xf32, #tpu.memory_space<vmem>>, %arg3: memref<1xf32, #tpu.memory_space<smem>>, %arg4: memref<1x128xf32, #tpu.memory_space<vmem>>) attributes {dimension_semantics = [#tpu.dimension_semantics<parallel>], iteration_bounds = array<i64: 3>, scalar_prefetch = 0 : i64, scratch_operands = 0 : i64, tpu.core_type = #tpu.core_type<tc>, window_params = [{transform_indices = @transform_0, window_bounds = array<i64: 128, 32>}, {pipeline_mode = #tpu.pipeline_mode<synchronous>, transform_indices = @transform_1, window_bounds = array<i64: 1, 32>}, {transform_indices = @transform_2, window_bounds = array<i64: 1>}, {transform_indices = @transform_3, window_bounds = array<i64: 1, 128>}]} {
    %c0 = arith.constant 0 : index
    %c0_0 = arith.constant 0 : index
    %0 = vector.load %arg1[%c0, %c0_0] : memref<128x32xf32, #tpu.memory_space<vmem>>, vector<128x32xf32>
    %c0_1 = arith.constant 0 : index
    %c0_2 = arith.constant 0 : index
    %1 = vector.load %arg2[%c0_1, %c0_2] : memref<1x32xf32, #tpu.memory_space<vmem>>, vector<1x32xf32>
    %2 = tpu.transpose %0, [1, 0] : vector<128x32xf32> -> vector<32x128xf32>
    %cst = arith.constant dense<0.000000e+00> : vector<1x128xf32>
    %3 = tpu.matmul %1, %2, %cst {dimension_numbers = #tpu.dot_dimension_numbers<[1], [0], [0], [1], [0, 0, 1, 1], [], []>} : vector<1x32xf32>, vector<32x128xf32>, vector<1x128xf32> -> vector<1x128xf32>
    %c0_3 = arith.constant 0 : index
    %4 = memref.load %arg3[%c0_3] : memref<1xf32, #tpu.memory_space<smem>>
    %5 = vector.broadcast %4 : f32 to vector<1x128xf32>
    %6 = arith.addf %3, %5 : vector<1x128xf32>
    %cst_4 = arith.constant 0.000000e+00 : f32
    %7 = vector.broadcast %cst_4 : f32 to vector<1x128xf32>
    %8 = arith.subf %7, %6 : vector<1x128xf32>
    %9 = math.exp %8 : vector<1x128xf32>
    %cst_5 = arith.constant 1.000000e+00 : f32
    %10 = vector.broadcast %cst_5 : f32 to vector<1x128xf32>
    %11 = arith.addf %10, %9 : vector<1x128xf32>
    %cst_6 = arith.constant 1.000000e+00 : f32
    %12 = vector.broadcast %cst_6 : f32 to vector<1x128xf32>
    %13 = arith.divf %12, %11 : vector<1x128xf32>
    %c0_7 = arith.constant 0 : index
    %c0_8 = arith.constant 0 : index
    %14 = vector.load %arg4[%c0_7, %c0_8] : memref<1x128xf32, #tpu.memory_space<vmem>>, vector<1x128xf32>
    tpu.vector_store %arg4[%c0_7, %c0_8], %13 {strides = array<i32>} : memref<1x128xf32, #tpu.memory_space<vmem>>, vector<1x128xf32>,
    return
  }
  func.func @transform_0(%arg0: i32) -> (i32, i32) {
    %c0_i32 = arith.constant 0 : i32
    %c0_i32_0 = arith.constant 0 : i32
    return %arg0, %c0_i32 : i32, i32
  }
  func.func @transform_1(%arg0: i32) -> (i32, i32) {
    %c0_i32 = arith.constant 0 : i32
    %c0_i32_0 = arith.constant 0 : i32
    %c0_i32_1 = arith.constant 0 : i32
    return %c0_i32, %c0_i32_0 : i32, i32
  }
  func.func @transform_2(%arg0: i32) -> i32 {
    %c0_i32 = arith.constant 0 : i32
    %c0_i32_0 = arith.constant 0 : i32
    return %c0_i32 : i32
  }
  func.func @transform_3(%arg0: i32) -> (i32, i32) {
    %c0_i32 = arith.constant 0 : i32
    %c0_i32_0 = arith.constant 0 : i32
    return %c0_i32, %arg0 : i32, i32
  }
}

</mosaic_0001>

<bundles_post_ra>
// kernel: tpu_custom_call.1
= control target key start
LH: loop header
LB: loop body
LE: loop exit
PB: predicated region body
PF: predicated region fallthrough
CT: control target
= control target key end

     0   :  { %s627_s0 = inlined_call_operand.vmem [shape: f32[384,32], index: 0, kind: input, shape index: {}]   ;;  %s628_s1 = inlined_call_operand.vmem [shape: f32[1,32], index: 1, kind: input, shape index: {}]   ;;  %s629_s2 = inlined_call_operand.<no memory space> [shape: f32[1], index: 2, kind: input, shape index: {}]   ;;  %s630_s3 = inlined_call_operand.hbm [shape: f32[1,384], index: 3, kind: output, shape index: {}]  }
   0x1   :  { %8 = sst [smem:[#allocation2]] %s629_s2 }
   0x2   :  { %9 = vsyncpa [#allocation4], 0 }
   0x3   :  { %11 = vsyncpa [#allocation4 + $0x1], 0  ;;  %s505_s14 = smov 0   ;;  %s507_s15 = smov 0  }
   0x4   :  { %s509_s16 = smov 0   ;;  %s511_s17 = smov 0  }
   0x5 LB: > { %s526_s2 = sadd.s32 4294967295, %s480_s17   ;;  %s350_s18 = sadd.s32 4294967294, %s480_s17   ;;  %s480_s17 = sphi %s511_s17, %s636_s17   ;;  %s476_s16 = sphi %s509_s16, %s635_s16   ;;  %s472_s15 = sphi %s507_s15, %s634_s15   ;;  %s468_s14 = sphi %s505_s14, %s633_s14  }
   0x6   : > { %s530_s19 = sadd.s32 1, %s480_s17   ;;  %s92_s20 = sadd.s32 1, %s476_s16 }
   0x7   : > { %s89_s21 = ssub.s32 %s480_s17, %s530_s19  ;;  %p102_p0 = scmp.ne.s32.totalorder %s476_s16, %s472_s15 }
   0x8   : > { %p90_p1 = scmp.eq.s32.totalorder %s89_s21, 0  ;;  %p103_p2 = scmp.eq.s32.totalorder %s526_s2, 2 }
   0x9   : > { %p108_p3 = scmp.ne.s32.totalorder %s472_s15, %s468_s14  ;;  %p109_p4 = scmp.eq.s32.totalorder %s350_s18, 2 }
   0xa   : > { %s541_s22 = scalar_select %p90_p1, %s476_s16, %s92_s20  }
   0xb   : > { %p543_p5 = por %p103_p2, %p102_p0  ;;  %p547_p6 = por %p109_p4, %p108_p3 }
   0xc   : > { %p353_p7 = scmp.ge.s32.totalorder %s480_s17, 1  ;;  %p142_p8 = scmp.lt.s32.totalorder %s480_s17, 4 }
   0xe   : > { %p143_p9 = pnand %p353_p7, %p142_p8 }
   0xf   : > { %s354_s25 = sshll.u32 (!%p143_p9), %s526_s2, 4  ;;  %s188_s5 = sld [smem:[#allocation2]] (!%p143_p9) }
  0x10   : > { %146 = sbr.rel (%p143_p9) target bundleno = 249 (0xf9), region = 32  ;;  %p166_p10 = scmp.lt.s32.totalorder (!%p143_p9), %s354_s25, 47 }
  0x11   : > { %s163_s6 = sand.u32 (!%p143_p9), 1, %s472_s15   ;;  %s291_s9 = scalar_lea.hbm (!%p143_p9), %s630_s3, %s526_s2 }
  0x12   : > { %s164_s10 = scalar_lea.vmem (!%p143_p9), [#allocation3], %s163_s6  ;;  %s295_s12 = sshll.u32 (!%p143_p9), %s291_s9, 4  ;;  %s296_s12 = int_to_ptr.hbm [resolvable:$true] %s295_s12 }
  0x13   : > { %s293_s11 = sshll.u32 (!%p143_p9), %s164_s10, 4  ;;  %s283_s13 = scalar_lea.sflag (!%p143_p9), [#allocation4], %s163_s6  ;;  %s294_s11 = int_to_ptr.vmem [resolvable:$true] %s293_s11 }
  0x14   : > { %s432_s2 = sshra.s32 (!%p143_p9), %s296_s12, 4  ;;  %s433_s2 = int_to_ptr.hbm [resolvable:$true] %s432_s2 }
  0x15   : > { %s638_s25 = smov (!%p166_p10, %s354_s25), 47  ;;  %vm190_vm0 = vcmask 261120   ;;  %v187_v16 = vld [vmem:[%s628_s1] sm:$0x1]  ;;  %v189_v17 = vstv %s188_s5  ;;  %s434_s18 = scalar_lea.hbm %s433_s2, 1 }
  0x16   : > { %s355_s26 = sshll.u32 %s638_s25, 3  ;;  %p435_p11 = scmp.ne.s32.totalorder %s433_s2, %s434_s18 }
  0x17   : > { %s557_s29 = scalar_lea.vmem %s627_s0, %s355_s26  ;;  %s438_s25 = scalar_lea.hbm %s630_s3, 3 }
  0x18   : > { %v186_v0 = vld [vmem:[%s557_s29 + $0x78] sm:$0xff]  ;;  %v185_v1 = vld [vmem:[%s557_s29 + $0x70] sm:$0xff]  ;;  %v184_v2 = vld [vmem:[%s557_s29 + $0x68] sm:$0xff]  ;;  %p436_p12 = pnand %p435_p11, %p543_p5  ;;  %p439_p0 = scmp.lt.s32.totalorder %s433_s2, %s630_s3 }
  0x19   : > { %356 = vmatpush.xpose.msk.msra.mxu0 %vm190_vm0, %v186_v0  ;;  %v183_v3 = vld [vmem:[%s557_s29 + $0x60] sm:$0xff]  ;;  %v182_v4 = vld [vmem:[%s557_s29 + $0x58] sm:$0xff]  ;;  %v181_v5 = vld [vmem:[%s557_s29 + $0x50] sm:$0xff]  ;;  %p440_p1 = scmp.lt.s32.totalorder %s438_s25, %s434_s18 }
  0x1a   : > { %v180_v6 = vld [vmem:[%s557_s29 + $0x48] sm:$0xff]  ;;  %v179_v7 = vld [vmem:[%s557_s29 + $0x40] sm:$0xff]  ;;  %v178_v8 = vld [vmem:[%s557_s29 + $0x38] sm:$0xff]  ;;  %p437_p13 = pneg %p436_p12 }
  0x1b   : > { %v177_v9 = vld [vmem:[%s557_s29 + $0x30] sm:$0xff]  ;;  %v176_v10 = vld [vmem:[%s557_s29 + $0x28] sm:$0xff]  ;;  %v175_v11 = vld [vmem:[%s557_s29 + $0x20] sm:$0xff]  ;;  %p441_p2 = por %p440_p1, %p439_p0 }
  0x1c   : > { %v174_v12 = vld [vmem:[%s557_s29 + $0x18] sm:$0xff]  ;;  %v173_v13 = vld [vmem:[%s557_s29 + $0x10] sm:$0xff]  ;;  %v172_v14 = vld [vmem:[%s557_s29 + $0x8] sm:$0xff] }
  0x1d   : > { %357 = vmatpush.xpose.msk.msra.mxu0 %vm190_vm0, %v185_v1  ;;  %v171_v15 = vld [vmem:[%s557_s29] sm:$0xff]  ;;  %p442_p3 = pnand %p441_p2, %p437_p13 }
  0x21   : > { %358 = vmatpush.xpose.msk.msra.mxu0 %vm190_vm0, %v184_v2 }
  0x25   : > { %359 = vmatpush.xpose.msk.msra.mxu0 %vm190_vm0, %v183_v3 }
  0x29   : > { %360 = vmatpush.xpose.msk.msra.mxu0 %vm190_vm0, %v182_v4 }
  0x2d   : > { %361 = vmatpush.xpose.msk.msra.mxu0 %vm190_vm0, %v181_v5 }
  0x31   : > { %362 = vmatpush.xpose.msk.msra.mxu0 %vm190_vm0, %v180_v6 }
  0x35   : > { %363 = vmatpush.xpose.msk.msra.mxu0 %vm190_vm0, %v179_v7 }
  0x39   : > { %364 = vmatpush.xpose.msk.msra.mxu0 %vm190_vm0, %v178_v8 }
  0x3d   : > { %365 = vmatpush.xpose.msk.msra.mxu0 %vm190_vm0, %v177_v9 }
  0x41   : > { %366 = vmatpush.xpose.msk.msra.mxu0 %vm190_vm0, %v176_v10 }
  0x45   : > { %367 = vmatpush.xpose.msk.msra.mxu0 %vm190_vm0, %v175_v11 }
  0x49   : > { %368 = vmatpush.xpose.msk.msra.mxu0 %vm190_vm0, %v174_v12 }
  0x4d   : > { %369 = vmatpush.xpose.msk.msra.mxu0 %vm190_vm0, %v173_v13 }
  0x51   : > { %370 = vmatpush.xpose.msk.msra.mxu0 %vm190_vm0, %v172_v14 }
  0x55   : > { %371 = vmatpush.xpose.msk.msra.mxu0 %vm190_vm0, %v171_v15 }
  0x58   : > { %372 = vmatmul.msk.f32.vlgmr.msra.gmra.mxu0 %vm190_vm0, %v187_v16 }
  0xd5   : > { %v259_v18 = vpop.f32.mrf.mxu0 }
  0xd6   : > { %v260_v19 = vadd.f32 %v259_v18, %v189_v17 }
  0xd8   : > { %v262_v20 = vsub.f32 0.0, %v260_v19 }
  0xda   : > { %v263_v21 = vmul.f32 1.442695, %v262_v20 }
  0xdc   : > { %414 = vpow2.f32 %v263_v21 }
  0xe2   : > { %v415_v22 = vpop.eup %414 }
  0xe3   : > { %v265_v23 = vadd.f32 1.0, %v415_v22 }
  0xe5   : > { %416 = vrcp.f32 %v265_v23  ;;  %v277_v27 = vand.u32 2147483648, %v265_v23  ;;  %v275_v29 = vand.u32 2147483647, %v265_v23  ;;  %vm271_vm2 = vweird.f32 %v265_v23 }
  0xe7   : > { %v278_v31 = vor.u32 1.1754944e-38, %v277_v27  ;;  %vm276_vm4 = vcmp.eq.f32.partialorder %v275_v29, 8.507059e+37 }
  0xeb   : > { %v417_v24 = vpop.eup %416 }
  0xec   : > { %v267_v25 = vmul.f32 %v417_v24, %v265_v23  ;;  %vm272_vm1 = vweird.f32 %v417_v24 }
  0xed   : > { %vm273_vm3 = vmor %vm271_vm2, %vm272_vm1 }
  0xee   : > { %v268_v26 = vsub.f32 1.0, %v267_v25 }
  0xf0   : > { %v269_v28 = vmul.f32 %v417_v24, %v268_v26 }
  0xf2   : > { %v270_v30 = vadd.f32 %v417_v24, %v269_v28 }
  0xf4   : > { %v274_v32 = vsel %vm273_vm3, %v417_v24, %v270_v30 }
  0xf5   : > { %v279_v33 = vsel %vm276_vm4, %v278_v31, %v274_v32 }
  0xf6   : > { %281 = vst [vmem:[%s164_s10] sm:$0x1] %v279_v33 }
  0xf7   : > { %445 = shalt.err (!%p442_p3)
}
  0xf8   : > { %375 = dma.vmem_to_hbm [thread:$0]  (%p543_p5), %s294_s11, 16, %s296_s12, %s283_s13  }
  0xf9 PF: > { %p381_p4 = scmp.ge.s32.totalorder %s480_s17, 2  ;;  %s307_s28 = sand.u32 1, %s468_s14  }
  0xfa   : > { %s308_s29 = scalar_lea.sflag [#allocation4], %s307_s28 }
  0xfb   : > { %p378_p7 = pnand %p381_p4, %p547_p6 }
  0xfd   : > { %p379_p8 = pneg %p378_p7 }
  0xff   : > { %463 = dma.done.wait (%p379_p8), %s308_s29, 16  }
 0x100   : > { %465 = vsyncadd (%p379_p8), %s308_s29, 4294967280  ;;  %p14_p9 = scmp.ge.s32.totalorder %s530_s19, 5   ;;  %s633_s14 = smov %s472_s15 }
 0x101   : > { %s634_s15 = smov %s476_s16  ;;  %s635_s16 = smov %s541_s22 }
 0x102   : > { %s636_s17 = smov %s530_s19  ;;  %16 = sbr.rel (!%p14_p9) target bundleno = 5 (0x5), region = 67 }
 0x107   :  { %313 = vsyncpa [#allocation4], 1 }
 0x108   :  { %315 = vsyncpa [#allocation4 + $0x1], 1 }

</bundles_post_ra>
